<compile_context>
chip_gen: v7x
topology: tpu7x:2x2x1
jax: 0.10.0
libtpu: 0.0.40
codegen_flags: <defaults>
</compile_context>

<pallas_src>
import functools

import jax
import jax.numpy as jnp
from jax.experimental import pallas as pl
from jax.experimental.pallas import tpu as pltpu


def _siamese_kernel(q1_ref, q2_ref, w1_ref, b1_ref, w2_ref, b2_ref,
                    o1_ref, o2_ref, *, rows):
    """Shared encoder applied to both branches inside one invocation.

    out_k = relu(q_k @ W1 + b1) @ W2 + b2  for k in {1, 2}, same W1/b1/W2/b2.

    The two row tiles are fused along the batch axis in VMEM so each MXU
    weight push processes 2*rows rows instead of two half-size matmuls.
    """
    x = jnp.concatenate([q1_ref[...], q2_ref[...]], axis=0)            # (2R, D) f32
    xb = x.astype(jnp.bfloat16)                                        # MXU-native feed

    h = jnp.dot(xb, w1_ref[...], preferred_element_type=jnp.float32)   # (2R, H) f32 acc
    h = jnp.maximum(h + b1_ref[...], 0.0)                              # bias + ReLU (f32, VPU)

    o = jnp.dot(h.astype(jnp.bfloat16), w2_ref[...],
                preferred_element_type=jnp.float32) + b2_ref[...]      # (2R, E) f32

    o1_ref[...] = o[:rows].astype(o1_ref.dtype)
    o2_ref[...] = o[rows:].astype(o2_ref.dtype)


def siamese_forward(q1, q2, params, *, max_row_tile=256):
    """Returns (embed1, embed2); both branches share the same kernel weights."""
    w1, b1, w2, b2 = params
    B, D = q1.shape
    assert q2.shape == (B, D)
    H = w1.shape[1]
    E = w2.shape[1]

    # f32 sublane tile is 8 rows: the in-VMEM concat and the o[:R]/o[R:] split
    # are free only while each half is 8-row aligned.
    assert B % 8 == 0, "batch must be a multiple of 8 (f32 sublane tile)"

    flops = 2 * (2 * B) * D * H + 2 * (2 * B) * H * E
    bytes_accessed = (2 * B * D * 4            # q1, q2 (f32)
                      + D * H * 2 + H * 4      # W1 (bf16), b1 (f32)
                      + H * E * 2 + E * 4      # W2 (bf16), b2 (f32)
                      + 2 * B * E * 4)         # two outputs (f32)
    cost = pl.CostEstimate(flops=flops, transcendentals=0,
                           bytes_accessed=bytes_accessed)

    out_shape = (jax.ShapeDtypeStruct((B, E), jnp.float32),
                 jax.ShapeDtypeStruct((B, E), jnp.float32))

    if B <= max_row_tile:
        # Small batch: single invocation, NO grid. A degenerate grid=(1,)
        # would still pay the per-step pipeline scaffolding for zero overlap.
        vmem = pltpu.MemorySpace.VMEM
        return pl.pallas_call(
            functools.partial(_siamese_kernel, rows=B),
            out_shape=out_shape,
            in_specs=[pl.BlockSpec(memory_space=vmem)] * 6,
            out_specs=(pl.BlockSpec(memory_space=vmem),
                       pl.BlockSpec(memory_space=vmem)),
            cost_estimate=cost,
        )(q1, q2, w1, b1, w2, b2)

    # Larger batch: row-tiled batch grid axis. Pick the largest divisor of B
    # that is <= max_row_tile and a multiple of 8.
    row_tile = max_row_tile - (max_row_tile % 8)
    while B % row_tile != 0:
        row_tile -= 8
    assert row_tile >= 8
    grid = (B // row_tile,)

    return pl.pallas_call(
        functools.partial(_siamese_kernel, rows=row_tile),
        out_shape=out_shape,
        grid=grid,
        in_specs=[
            pl.BlockSpec((row_tile, D), lambda i: (i, 0)),   # q1 tile
            pl.BlockSpec((row_tile, D), lambda i: (i, 0)),   # q2 tile
            pl.BlockSpec((D, H), lambda i: (0, 0)),          # W1: VMEM-resident across steps
            pl.BlockSpec((1, H), lambda i: (0, 0)),          # b1
            pl.BlockSpec((H, E), lambda i: (0, 0)),          # W2: VMEM-resident across steps
            pl.BlockSpec((1, E), lambda i: (0, 0)),          # b2
        ],
        out_specs=(
            pl.BlockSpec((row_tile, E), lambda i: (i, 0)),   # lane-dense (E % 128 == 0)
            pl.BlockSpec((row_tile, E), lambda i: (i, 0)),
        ),
        compiler_params=pltpu.CompilerParams(
            # Only shard the batch axis across v7x's two TensorCores once each
            # core has enough rows to amortize its own weight DMA.
            dimension_semantics=(
                "parallel" if row_tile >= 512 else "arbitrary",),
        ),
        cost_estimate=cost,
    )(q1, q2, w1, b1, w2, b2)


def init_params(key, in_dim, hidden, embed_dim):
    k1, k2, k3, k4 = jax.random.split(key, 4)
    # Weights stored in bf16 (MXU-native, half the DMA/VMEM bytes); biases f32.
    w1 = (jax.random.normal(k1, (in_dim, hidden), jnp.float32) * 0.1).astype(jnp.bfloat16)
    b1 = jax.random.normal(k2, (1, hidden), jnp.float32) * 0.01
    w2 = (jax.random.normal(k3, (hidden, embed_dim), jnp.float32) * 0.1).astype(jnp.bfloat16)
    b2 = jax.random.normal(k4, (1, embed_dim), jnp.float32) * 0.01
    return w1, b1, w2, b2


def reference_forward(q1, q2, params):
    """Plain-JAX reference with the same bf16-in / f32-accumulate math."""
    w1, b1, w2, b2 = params

    def half(x):
        h = jnp.dot(x.astype(jnp.bfloat16), w1,
                    preferred_element_type=jnp.float32) + b1
        h = jnp.maximum(h, 0.0)
        return jnp.dot(h.astype(jnp.bfloat16), w2,
                       preferred_element_type=jnp.float32) + b2

    return half(q1), half(q2)


if __name__ == "__main__":
    # Lane-dense encoder shapes (all feature dims multiples of 128).
    D, H, E = 128, 256, 128

    key = jax.random.PRNGKey(0)
    k_q1, k_q2, k_qb, k_p = jax.random.split(key, 4)
    params = init_params(k_p, D, H, E)

    fwd = jax.jit(siamese_forward)

    # --- Small-batch path (no grid, everything VMEM-resident) ---
    B_small = 8
    q1_s = jax.random.normal(k_q1, (B_small, D), jnp.float32)
    q2_s = jax.random.normal(k_q2, (B_small, D), jnp.float32)
    o1_s, o2_s = fwd(q1_s, q2_s, params)
    jax.block_until_ready((o1_s, o2_s))

    r1_s, r2_s = reference_forward(q1_s, q2_s, params)
    assert o1_s.shape == (B_small, E) and o2_s.shape == (B_small, E)
    assert jnp.allclose(o1_s, r1_s, atol=1e-2, rtol=1e-2)
    assert jnp.allclose(o2_s, r2_s, atol=1e-2, rtol=1e-2)

    # --- Row-tiled path (batch grid axis, weights resident across steps) ---
    B_big = 512
    q1_b = jax.random.normal(k_qb, (B_big, D), jnp.float32)
    q2_b = jax.random.normal(jax.random.fold_in(k_qb, 1), (B_big, D), jnp.float32)
    o1_b, o2_b = fwd(q1_b, q2_b, params)
    jax.block_until_ready((o1_b, o2_b))

    r1_b, r2_b = reference_forward(q1_b, q2_b, params)
    assert o1_b.shape == (B_big, E) and o2_b.shape == (B_big, E)
    assert jnp.allclose(o1_b, r1_b, atol=1e-2, rtol=1e-2)
    assert jnp.allclose(o2_b, r2_b, atol=1e-2, rtol=1e-2)

    print("KERNEL_OK")
</pallas_src>

<mosaic_0001>
module attributes {stable_mosaic.version = 11 : i64} {
  func.func @_siamese_kernel(%arg0: memref<8x128xf32, #tpu.memory_space<vmem>>, %arg1: memref<8x128xf32, #tpu.memory_space<vmem>>, %arg2: memref<128x256xbf16, #tpu.memory_space<vmem>>, %arg3: memref<1x256xf32, #tpu.memory_space<vmem>>, %arg4: memref<256x128xbf16, #tpu.memory_space<vmem>>, %arg5: memref<1x128xf32, #tpu.memory_space<vmem>>, %arg6: memref<8x128xf32, #tpu.memory_space<vmem>>, %arg7: memref<8x128xf32, #tpu.memory_space<vmem>>) attributes {dimension_semantics = [], scalar_prefetch = 0 : i64, scratch_operands = 0 : i64, tpu.core_type = #tpu.core_type<tc>} {
    %c0 = arith.constant 0 : index
    %c0_0 = arith.constant 0 : index
    %0 = vector.load %arg0[%c0, %c0_0] : memref<8x128xf32, #tpu.memory_space<vmem>>, vector<8x128xf32>
    %c0_1 = arith.constant 0 : index
    %c0_2 = arith.constant 0 : index
    %1 = vector.load %arg1[%c0_1, %c0_2] : memref<8x128xf32, #tpu.memory_space<vmem>>, vector<8x128xf32>
    %2 = tpu.concatenate %0, %1 in 0 : vector<8x128xf32>, vector<8x128xf32> -> vector<16x128xf32>
    %3 = arith.truncf %2 : vector<16x128xf32> to vector<16x128xbf16>
    %c0_3 = arith.constant 0 : index
    %c0_4 = arith.constant 0 : index
    %4 = vector.load %arg2[%c0_3, %c0_4] : memref<128x256xbf16, #tpu.memory_space<vmem>>, vector<128x256xbf16>
    %cst = arith.constant dense<0.000000e+00> : vector<16x256xf32>
    %5 = tpu.matmul %3, %4, %cst {dimension_numbers = #tpu.dot_dimension_numbers<[1], [0], [0], [1], [0, 0, 1, 1], [], []>} : vector<16x128xbf16>, vector<128x256xbf16>, vector<16x256xf32> -> vector<16x256xf32>
    %c0_5 = arith.constant 0 : index
    %c0_6 = arith.constant 0 : index
    %6 = vector.load %arg3[%c0_5, %c0_6] : memref<1x256xf32, #tpu.memory_space<vmem>>, vector<1x256xf32>
    %7 = vector.broadcast %6 : vector<1x256xf32> to vector<16x256xf32>
    %8 = arith.addf %5, %7 : vector<16x256xf32>
    %cst_7 = arith.constant 0.000000e+00 : f32
    %9 = vector.broadcast %cst_7 : f32 to vector<16x256xf32>
    %10 = arith.maximumf %8, %9 : vector<16x256xf32>
    %11 = arith.truncf %10 : vector<16x256xf32> to vector<16x256xbf16>
    %c0_8 = arith.constant 0 : index
    %c0_9 = arith.constant 0 : index
    %12 = vector.load %arg4[%c0_8, %c0_9] : memref<256x128xbf16, #tpu.memory_space<vmem>>, vector<256x128xbf16>
    %cst_10 = arith.constant dense<0.000000e+00> : vector<16x128xf32>
    %13 = tpu.matmul %11, %12, %cst_10 {dimension_numbers = #tpu.dot_dimension_numbers<[1], [0], [0], [1], [0, 0, 1, 1], [], []>} : vector<16x256xbf16>, vector<256x128xbf16>, vector<16x128xf32> -> vector<16x128xf32>
    %c0_11 = arith.constant 0 : index
    %c0_12 = arith.constant 0 : index
    %14 = vector.load %arg5[%c0_11, %c0_12] : memref<1x128xf32, #tpu.memory_space<vmem>>, vector<1x128xf32>
    %15 = vector.broadcast %14 : vector<1x128xf32> to vector<16x128xf32>
    %16 = arith.addf %13, %15 : vector<16x128xf32>
    %17 = vector.extract_strided_slice %16 {offsets = [0, 0], sizes = [8, 128], strides = [1, 1]} : vector<16x128xf32> to vector<8x128xf32>
    %c0_13 = arith.constant 0 : index
    %c0_14 = arith.constant 0 : index
    %18 = vector.load %arg6[%c0_13, %c0_14] : memref<8x128xf32, #tpu.memory_space<vmem>>, vector<8x128xf32>
    tpu.vector_store %arg6[%c0_13, %c0_14], %17 {strides = array<i32>} : memref<8x128xf32, #tpu.memory_space<vmem>>, vector<8x128xf32>,
    %19 = vector.extract_strided_slice %16 {offsets = [8, 0], sizes = [8, 128], strides = [1, 1]} : vector<16x128xf32> to vector<8x128xf32>
    %c0_15 = arith.constant 0 : index
    %c0_16 = arith.constant 0 : index
    %20 = vector.load %arg7[%c0_15, %c0_16] : memref<8x128xf32, #tpu.memory_space<vmem>>, vector<8x128xf32>
    tpu.vector_store %arg7[%c0_15, %c0_16], %19 {strides = array<i32>} : memref<8x128xf32, #tpu.memory_space<vmem>>, vector<8x128xf32>,
    return
  }
}

</mosaic_0001>

<bundles_post_ra>
// kernel: siamese_forward.1
= control target key start
LH: loop header
LB: loop body
LE: loop exit
PB: predicated region body
PF: predicated region fallthrough
CT: control target
= control target key end

     0   :  { %13 = vsyncpa [#allocation3], 0  ;;  %s825_s0 = inlined_call_operand.hbm [shape: f32[8,128], index: 0, kind: input, shape index: {}]   ;;  %s826_s1 = inlined_call_operand.hbm [shape: f32[8,128], index: 1, kind: input, shape index: {}]   ;;  %s827_s2 = inlined_call_operand.hbm [shape: bf16[128,256], index: 2, kind: input, shape index: {}]   ;;  %s828_s3 = inlined_call_operand.vmem [shape: f32[1,256], index: 3, kind: input, shape index: {}]   ;;  %s829_s4 = inlined_call_operand.hbm [shape: bf16[256,128], index: 4, kind: input, shape index: {}]   ;;  %s830_s5 = inlined_call_operand.vmem [shape: f32[1,128], index: 5, kind: input, shape index: {}]   ;;  %s831_s6 = inlined_call_operand.hbm [shape: f32[8,128], index: 6, kind: output, shape index: {0}]   ;;  %s832_s7 = inlined_call_operand.hbm [shape: f32[8,128], index: 7, kind: output, shape index: {1}]  }
   0x1   :  { %14 = vsyncpa [#allocation6], 0 }
   0x2   :  { %15 = vsyncpa [#allocation9], 0 }
   0x3   :  { %16 = vsyncpa [#allocation4], 0 }
   0x4   :  { %17 = vsyncpa [#allocation12], 0  ;;  %s696_s24 = smov [#allocation5]   ;;  %s697_s26 = smov [#allocation2]  }
   0x5   :  { %s34_s25 = sshll.u32 %s696_s24, 4  ;;  %s24_s27 = sshll.u32 %s697_s26, 4  ;;  %s35_s25 = int_to_ptr.vmem [resolvable:$true] %s34_s25  ;;  %s25_s27 = int_to_ptr.vmem [resolvable:$true] %s24_s27 }
   0x6   :  { %s554_s30 = scalar_lea.hbm %s826_s1, 128 }
   0x7   :  { %p555_p0 = scmp.ne.s32.totalorder %s826_s1, %s554_s30  ;;  %p558_p1 = scmp.lt.u32.totalorder %s554_s30, %s826_s1 }
   0x9   :  { %p560_p2 = pnand %p558_p1, %p555_p0 }
   0xb   :  { %563 = shalt.err (!%p560_p2)
}
   0xc   :  { %s564_s12 = scalar_lea.vmem %s35_s25, 128  ;;  %p569_p4 = scmp.lt.s32.totalorder %s35_s25, %s35_s25 }
   0xd   :  { %p565_p3 = scmp.ne.s32.totalorder %s35_s25, %s564_s12  ;;  %p570_p5 = scmp.lt.s32.totalorder %s564_s12, %s564_s12 }
   0xf   :  { %p571_p6 = por %p570_p5, %p569_p4 }
  0x11   :  { %p572_p7 = pnand %p571_p6, %p565_p3 }
  0x13   :  { %575 = shalt.err (!%p572_p7)
}
  0x14   :  { %37 = dma.hbm_to_vmem [thread:$0]  %s826_s1, 128, %s35_s25, [#allocation6]  }
  0x15   :  { %s576_s17 = scalar_lea.hbm %s825_s0, 128 }
  0x16   :  { %p577_p8 = scmp.ne.s32.totalorder %s825_s0, %s576_s17  ;;  %p580_p9 = scmp.lt.u32.totalorder %s576_s17, %s825_s0 }
  0x18   :  { %p582_p10 = pnand %p580_p9, %p577_p8 }
  0x1a   :  { %585 = shalt.err (!%p582_p10)
}
  0x1b   :  { %s586_s22 = scalar_lea.vmem %s25_s27, 128  ;;  %p591_p12 = scmp.lt.s32.totalorder %s25_s27, %s25_s27 }
  0x1c   :  { %p587_p11 = scmp.ne.s32.totalorder %s25_s27, %s586_s22  ;;  %p592_p13 = scmp.lt.s32.totalorder %s586_s22, %s586_s22 }
  0x1e   :  { %p593_p0 = por %p592_p13, %p591_p12 }
  0x20   :  { %p594_p1 = pnand %p593_p0, %p587_p11 }
  0x22   :  { %597 = shalt.err (!%p594_p1)
}
  0x23   :  { %27 = dma.hbm_to_vmem [thread:$0]  %s825_s0, 128, %s25_s27, [#allocation3]  }
  0x24   :  { %s698_s24 = smov [#allocation7]   ;;  %s598_s29 = scalar_lea.hbm %s827_s2, 2048 }
  0x25   :  { %s43_s25 = sshll.u32 %s698_s24, 4  ;;  %p599_p2 = scmp.ne.s32.totalorder %s827_s2, %s598_s29  ;;  %s44_s25 = int_to_ptr.vmem [resolvable:$true] %s43_s25 }
  0x26   :  { %p602_p3 = scmp.lt.u32.totalorder %s598_s29, %s827_s2 }
  0x28   :  { %p604_p4 = pnand %p602_p3, %p599_p2 }
  0x2a   :  { %607 = shalt.err (!%p604_p4)
}
  0x2b   :  { %s608_s11 = scalar_lea.vmem %s44_s25, 2048  ;;  %p613_p6 = scmp.lt.s32.totalorder %s44_s25, %s44_s25 }
  0x2c   :  { %p609_p5 = scmp.ne.s32.totalorder %s44_s25, %s608_s11  ;;  %p614_p7 = scmp.lt.s32.totalorder %s608_s11, %s608_s11 }
  0x2e   :  { %p615_p8 = por %p614_p7, %p613_p6 }
  0x30   :  { %p616_p9 = pnand %p615_p8, %p609_p5 }
  0x32   :  { %619 = shalt.err (!%p616_p9)
}
  0x33   :  { %s699_s0 = smov 128   ;;  %s700_s27 = smov 8  }
  0x34   :  { %49 = dma.hbm_to_vmem [thread:$0]  %s827_s2, 2048, %s44_s25, [#allocation6], %s699_s0, %s699_s0, %s700_s27  }
  0x35   :  { %s701_s14 = smov [#allocation8]   ;;  %s620_s18 = scalar_lea.hbm %s829_s4, 2048 }
  0x36   :  { %s57_s15 = sshll.u32 %s701_s14, 4  ;;  %p621_p10 = scmp.ne.s32.totalorder %s829_s4, %s620_s18  ;;  %s58_s15 = int_to_ptr.vmem [resolvable:$true] %s57_s15 }
  0x37   :  { %p624_p11 = scmp.lt.u32.totalorder %s620_s18, %s829_s4 }
  0x39   :  { %p626_p12 = pnand %p624_p11, %p621_p10 }
  0x3b   :  { %629 = shalt.err (!%p626_p12)
}
  0x3c   :  { %s630_s1 = scalar_lea.vmem %s58_s15, 2048  ;;  %p635_p0 = scmp.lt.s32.totalorder %s58_s15, %s58_s15 }
  0x3d   :  { %p631_p13 = scmp.ne.s32.totalorder %s58_s15, %s630_s1  ;;  %p636_p1 = scmp.lt.s32.totalorder %s630_s1, %s630_s1 }
  0x3f   :  { %p637_p2 = por %p636_p1, %p635_p0 }
  0x41   :  { %p638_p3 = pnand %p637_p2, %p631_p13 }
  0x43   :  { %641 = shalt.err (!%p638_p3)
}
  0x44   :  { %s702_s2 = smov 64   ;;  %s703_s23 = smov 4  }
  0x45   :  { %63 = dma.hbm_to_vmem [thread:$0]  %s829_s4, 2048, %s58_s15, [#allocation9], %s702_s2, %s702_s2, %s703_s23  }
  0x46   :  { %686 = dma.done.wait [#allocation3], 128  }
  0x47   :  { %687 = vsyncadd [#allocation3], 4294967168 }
  0x48   :  { %688 = dma.done.wait [#allocation6], 2176  }
  0x49   :  { %689 = vsyncadd [#allocation6], 4294965120 }
  0x4a   :  { %690 = dma.done.wait [#allocation9], 2048  }
  0x4b   :  { %691 = vsyncadd [#allocation9], 4294965248  ;;  %v704_v0 = vmov 0   ;;  %v514_v1 = vld [vmem:[#allocation7 + $0x4] ss:$8 sps:$4 sm:$0xff]   ;;  %v542_v16 = vld [vmem:[#allocation8 + $0x50] sm:$0xff]   ;;  %v100_v36 = vlaneseq }
  0x4c   :  { %222 = vmatprep.mubr.bf16.mxu0 %v704_v0  ;;  %v516_v2 = vld [vmem:[#allocation7] ss:$8 sps:$4 sm:$0xff]   ;;  %190 = vmatprep.subr.bf16.mxu0 %v514_v1  ;;  %v517_v3 = vld [vmem:[#allocation7 + $0x14] ss:$8 sps:$4 sm:$0xff]   ;;  %v519_v4 = vld [vmem:[#allocation7 + $0x10] ss:$8 sps:$4 sm:$0xff]  }
  0x4d   :  { %191 = vmatpush1.bf16.msra.mxu0 %v516_v2  ;;  %v520_v5 = vld [vmem:[#allocation7 + $0x24] ss:$8 sps:$4 sm:$0xff]   ;;  %v522_v6 = vld [vmem:[#allocation7 + $0x20] ss:$8 sps:$4 sm:$0xff]   ;;  %v523_v7 = vld [vmem:[#allocation7 + $0x34] ss:$8 sps:$4 sm:$0xff]  }
  0x4e   :  { %192 = vmatprep.subr.bf16.mxu0 %v517_v3  ;;  %v525_v8 = vld [vmem:[#allocation7 + $0x30] ss:$8 sps:$4 sm:$0xff]   ;;  %v526_v9 = vld [vmem:[#allocation7 + $0x44] ss:$8 sps:$4 sm:$0xff]   ;;  %v528_v11 = vld [vmem:[#allocation7 + $0x40] ss:$8 sps:$4 sm:$0xff]  }
  0x4f   :  { %v538_v10 = vld [vmem:[#allocation8 + $0x40] sm:$0xff]   ;;  %v529_v13 = vld [vmem:[#allocation7 + $0x54] ss:$8 sps:$4 sm:$0xff]   ;;  %v540_v14 = vld [vmem:[#allocation8 + $0x48] sm:$0xff]   ;;  %v101_v37 = vshrl.u32 %v100_v36, 7  ;;  %s705_s29 = smov [#allocation10]  }
  0x50   :  { %v539_v12 = vld [vmem:[#allocation8] sm:$0xff]   ;;  %481 = vmatprep.subr.bf16.mxu1 %v538_v10  ;;  %v541_v15 = vld [vmem:[#allocation8 + $0x8] sm:$0xff]   ;;  %v531_v17 = vld [vmem:[#allocation7 + $0x50] ss:$8 sps:$4 sm:$0xff]   ;;  %s423_s30 = sshll.u32 %s705_s29, 4  ;;  %s706_s8 = smov [#allocation11]   ;;  %s424_s30 = int_to_ptr.vmem [resolvable:$true] %s423_s30 }
  0x51   :  { %193 = vmatpush1.bf16.msra.mxu0 %v519_v4  ;;  %482 = vmatpush3.bf16.msra.mxu1 %v539_v12  ;;  %v532_v18 = vld [vmem:[#allocation7 + $0x64] ss:$8 sps:$4 sm:$0xff]   ;;  %v543_v19 = vld [vmem:[#allocation8 + $0x10] sm:$0xff]   ;;  %v544_v20 = vld [vmem:[#allocation8 + $0x58] sm:$0xff]   ;;  %v102_v38 = vsub.s32 0, %v101_v37  ;;  %v106_v40 = vsub.s32 1, %v101_v37  ;;  %p647_p5 = scmp.lt.s32.totalorder %s424_s30, %s424_s30 }
  0x52   :  { %194 = vmatprep.subr.bf16.mxu0 %v520_v5  ;;  %483 = vmatprep.subr.bf16.mxu1 %v540_v14  ;;  %v534_v21 = vld [vmem:[#allocation7 + $0x60] ss:$8 sps:$4 sm:$0xff]   ;;  %v535_v22 = vld [vmem:[#allocation7 + $0x74] ss:$8 sps:$4 sm:$0xff]   ;;  %v537_v25 = vld [vmem:[#allocation7 + $0x70] ss:$8 sps:$4 sm:$0xff]  }
  0x53   :  { %v545_v23 = vld [vmem:[#allocation8 + $0x18] sm:$0xff]   ;;  %v546_v24 = vld [vmem:[#allocation8 + $0x60] sm:$0xff]   ;;  %v79_v26 = vld [vmem:[#allocation2] sm:$0xff]  ;;  %s433_s9 = sshll.u32 %s706_s8, 4  ;;  %s642_s10 = scalar_lea.vmem %s424_s30, 128  ;;  %s434_s9 = int_to_ptr.vmem [resolvable:$true] %s433_s9 }
  0x54   :  { %v80_v27 = vld [vmem:[#allocation5] sm:$0xff]  ;;  %v547_v28 = vld [vmem:[#allocation8 + $0x20] sm:$0xff]   ;;  %v548_v29 = vld [vmem:[#allocation8 + $0x68] sm:$0xff]   ;;  %p643_p4 = scmp.ne.s32.totalorder %s424_s30, %s642_s10  ;;  %p648_p6 = scmp.lt.s32.totalorder %s642_s10, %s642_s10 }
  0x55   :  { %195 = vmatpush1.bf16.msra.mxu0 %v522_v6  ;;  %484 = vmatpush3.bf16.msra.mxu1 %v541_v15  ;;  %v81_v30 = vpack.c.bf16 %v80_v27, %v79_v26  ;;  %v549_v31 = vld [vmem:[#allocation8 + $0x28] sm:$0xff]   ;;  %v550_v32 = vld [vmem:[#allocation8 + $0x70] sm:$0xff]   ;;  %v552_v34 = vld [vmem:[#allocation8 + $0x78] sm:$0xff]  }
  0x56   :  { %196 = vmatprep.subr.bf16.mxu0 %v523_v7  ;;  %485 = vmatprep.subr.bf16.mxu1 %v542_v16  ;;  %v551_v33 = vld [vmem:[#allocation8 + $0x30] sm:$0xff]   ;;  %v553_v35 = vld [vmem:[#allocation8 + $0x38] sm:$0xff]   ;;  %p649_p7 = por %p648_p6, %p647_p5 }
  0x57   :  { %v98_v39 = vld [vmem:[%s828_s3] sm:$0x3] }
  0x58   :  { %v103_v41 = vrot.slane %v98_v39, %v102_v38  ;;  %v107_v42 = vrot.slane %v98_v39, %v106_v40  ;;  %v464_v58 = vld [vmem:[%s830_s5] ss:$0 sm:$0xff]  ;;  %p650_p8 = pnand %p649_p7, %p643_p4 }
  0x59   :  { %197 = vmatpush1.bf16.msra.mxu0 %v525_v8  ;;  %486 = vmatpush3.bf16.msra.mxu1 %v543_v19 }
  0x5a   :  { %198 = vmatprep.subr.bf16.mxu0 %v526_v9  ;;  %487 = vmatprep.subr.bf16.mxu1 %v544_v20 }
  0x5d   :  { %199 = vmatpush1.bf16.msra.mxu0 %v528_v11  ;;  %488 = vmatpush3.bf16.msra.mxu1 %v545_v23 }
  0x5e   :  { %200 = vmatprep.subr.bf16.mxu0 %v529_v13  ;;  %489 = vmatprep.subr.bf16.mxu1 %v546_v24 }
  0x61   :  { %201 = vmatpush1.bf16.msra.mxu0 %v531_v17  ;;  %490 = vmatpush3.bf16.msra.mxu1 %v547_v28 }
  0x62   :  { %202 = vmatprep.subr.bf16.mxu0 %v532_v18  ;;  %491 = vmatprep.subr.bf16.mxu1 %v548_v29 }
  0x65   :  { %203 = vmatpush1.bf16.msra.mxu0 %v534_v21  ;;  %492 = vmatpush3.bf16.msra.mxu1 %v549_v31 }
  0x66   :  { %204 = vmatprep.subr.bf16.mxu0 %v535_v22  ;;  %493 = vmatprep.subr.bf16.mxu1 %v550_v32 }
  0x69   :  { %205 = vmatpush1.bf16.msra.mxu0 %v537_v25  ;;  %494 = vmatpush3.bf16.msra.mxu1 %v551_v33 }
  0x6a   :  { %495 = vmatprep.subr.bf16.mxu1 %v552_v34 }
  0x6c   :  { %223 = vmatmul.mubr.bf16.vlgmr.msra.gmra.mrb[0].mxu0 %v81_v30 }
  0x6d   :  { %496 = vmatpush3.bf16.msra.mxu1 %v553_v35 }
 0x13f   :  { %v224_v43 = vpop.f32.mrb[0].mxu0 }
 0x140   :  { %v225_v44 = vadd.f32 %v224_v43, %v103_v41  ;;  %v226_v45 = vpop.f32.mrb[1].mxu0 }
 0x141   :  { %v227_v46 = vadd.f32 %v226_v45, %v107_v42  ;;  %v228_v47 = vpop.f32.mrb[2].mxu0 }
 0x142   :  { %v229_v48 = vadd.f32 %v228_v47, %v103_v41  ;;  %v230_v49 = vpop.f32.mrb[3].mxu0  ;;  %v233_v51 = vmax.f32 %v225_v44, 0.0 }
 0x143   :  { %v231_v50 = vadd.f32 %v230_v49, %v107_v42  ;;  %v234_v53 = vmax.f32 %v227_v46, 0.0 }
 0x144   :  { %v235_v52 = vmax.f32 %v229_v48, 0.0 }
 0x145   :  { %v236_v54 = vmax.f32 %v231_v50, 0.0 }
 0x146   :  { %v237_v55 = vpack.c.bf16 %v235_v52, %v233_v51 }
 0x147   :  { %v238_v56 = vpack.c.bf16 %v236_v54, %v234_v53 }
 0x149   :  { %406 = vmatprep.mubr.bf16.mxu1 %v238_v56 }
 0x14a   :  { %407 = vmatmul.mubr.bf16.vlgmr.msra.gmra.mrb[0].mxu1 %v237_v55 }
 0x21d   :  { %v497_v57 = vpop.f32.mrb[0].mxu1 }
 0x21e   :  { %v498_v59 = vpop.f32.mrb[1].mxu1 }
 0x21f   :  { %v499_v60 = vadd.f32 %v498_v59, %v497_v57  ;;  %v500_v61 = vpop.f32.mrb[2].mxu1 }
 0x220   :  { %v501_v62 = vpop.f32.mrb[3].mxu1 }
 0x221   :  { %v409_v63 = vadd.f32 %v499_v60, %v464_v58  ;;  %v502_v0 = vadd.f32 %v501_v62, %v500_v61 }
 0x223   :  { %415 = vst [vmem:[#allocation10] sm:$0xff] %v409_v63  ;;  %v412_v1 = vadd.f32 %v502_v0, %v464_v58 }
 0x224   :  { %653 = shalt.err (!%p650_p8)
}
 0x225   :  { %s654_s0 = scalar_lea.hbm %s831_s6, 128 }
 0x226   :  { %p655_p9 = scmp.ne.s32.totalorder %s831_s6, %s654_s0  ;;  %p658_p10 = scmp.lt.u32.totalorder %s654_s0, %s831_s6 }
 0x228   :  { %p660_p11 = pnand %p658_p10, %p655_p9 }
 0x22a   :  { %663 = shalt.err (!%p660_p11)
}
 0x22b   :  { %426 = dma.vmem_to_hbm [thread:$0]  %s424_s30, 128, %s831_s6, [#allocation4]   ;;  %416 = vst [vmem:[#allocation11] sm:$0xff] %v412_v1 }
 0x22c   :  { %s664_s17 = scalar_lea.vmem %s434_s9, 128  ;;  %p669_p13 = scmp.lt.s32.totalorder %s434_s9, %s434_s9 }
 0x22d   :  { %p665_p12 = scmp.ne.s32.totalorder %s434_s9, %s664_s17  ;;  %p670_p0 = scmp.lt.s32.totalorder %s664_s17, %s664_s17 }
 0x22f   :  { %p671_p1 = por %p670_p0, %p669_p13 }
 0x231   :  { %p672_p2 = pnand %p671_p1, %p665_p12 }
 0x233   :  { %675 = shalt.err (!%p672_p2)
}
 0x234   :  { %s676_s20 = scalar_lea.hbm %s832_s7, 128 }
 0x235   :  { %p677_p3 = scmp.ne.s32.totalorder %s832_s7, %s676_s20  ;;  %p680_p4 = scmp.lt.u32.totalorder %s676_s20, %s832_s7 }
 0x237   :  { %p682_p5 = pnand %p680_p4, %p677_p3 }
 0x239   :  { %685 = shalt.err (!%p682_p5)
}
 0x23a   :  { %436 = dma.vmem_to_hbm [thread:$0]  %s434_s9, 128, %s832_s7, [#allocation12]  }
 0x23b   :  { %692 = dma.done.wait [#allocation4], 128  }
 0x23c   :  { %693 = vsyncadd [#allocation4], 4294967168 }
 0x23d   :  { %694 = dma.done.wait [#allocation12], 128  }
 0x23e   :  { %695 = vsyncadd [#allocation12], 4294967168 }
 0x23f   :  { %443 = vsyncpa [#allocation3], 1 }
 0x240   :  { %444 = vsyncpa [#allocation6], 1 }
 0x241   :  { %445 = vsyncpa [#allocation9], 1 }
 0x242   :  { %446 = vsyncpa [#allocation4], 1 }
 0x243   :  { %447 = vsyncpa [#allocation12], 1 }

</bundles_post_ra>
